<compile_context>
chip_gen: v5e
topology: v5e:2x2
jax: 0.10.0
libtpu: 0.0.40
codegen_flags: <defaults>
</compile_context>

<pallas_src>
import math
import functools

import numpy as np
import jax
import jax.numpy as jnp
from jax.experimental import pallas as pl
from jax.experimental.pallas import tpu as pltpu


def _round_up(x, m):
    return -(-x // m) * m


# ------------------------------------------------------------------ matmul kernels

def _mm_kernel_single(a_ref, b_ref, bias_ref, o_ref, *, act):
    r = jnp.dot(a_ref[...], b_ref[...], preferred_element_type=jnp.float32)
    r = r + bias_ref[...]
    if act == "silu":
        r = r * jax.nn.sigmoid(r)
    o_ref[...] = r.astype(o_ref.dtype)


def _mm_kernel_acc(a_ref, b_ref, bias_ref, o_ref, acc_ref, *, act):
    @pl.when(pl.program_id(2) == 0)
    def _():
        acc_ref[...] = jnp.zeros_like(acc_ref)

    acc_ref[...] += jnp.dot(a_ref[...], b_ref[...],
                            preferred_element_type=jnp.float32)

    @pl.when(pl.program_id(2) == pl.num_programs(2) - 1)
    def _():
        r = acc_ref[...] + bias_ref[...]
        if act == "silu":
            r = r * jax.nn.sigmoid(r)
        o_ref[...] = r.astype(o_ref.dtype)


@functools.partial(jax.jit, static_argnames=("act",))
def pallas_matmul(a, b, bias=None, *, act=None):
    """a: (M, K), b: (K, N), bias: (N,) or None -> (M, N) f32.

    Operands fed to the MXU in bf16; accumulation and epilogue stay f32 (v5e-safe)."""
    M, K = a.shape
    _, N = b.shape
    Kp = _round_up(K, 128)
    Np = _round_up(N, 128)
    bm = 256 if M >= 256 else _round_up(M, 8)
    Mp = _round_up(M, bm)
    if Np <= 512:
        bn = Np
    elif Np % 512 == 0:
        bn = 512
    elif Np % 256 == 0:
        bn = 256
    else:
        bn = 128
    # Single reduction step whenever K fits comfortably in VMEM (true for this model).
    if Kp <= 2304:
        bk = Kp
    else:
        bk = next(c for c in (2048, 1536, 1024, 512, 256, 128) if Kp % c == 0)

    ap = a.astype(jnp.bfloat16)
    bp = b.astype(jnp.bfloat16)
    if (Mp, Kp) != (M, K):
        ap = jnp.pad(ap, ((0, Mp - M), (0, Kp - K)))
    if (Kp, Np) != (K, N):
        bp = jnp.pad(bp, ((0, Kp - K), (0, Np - N)))
    if bias is None:
        biasp = jnp.zeros((1, Np), jnp.float32)
    else:
        biasp = bias.astype(jnp.float32).reshape(1, N)
        if Np != N:
            biasp = jnp.pad(biasp, ((0, 0), (0, Np - N)))

    if bk == Kp:
        out = pl.pallas_call(
            functools.partial(_mm_kernel_single, act=act),
            out_shape=jax.ShapeDtypeStruct((Mp, Np), jnp.float32),
            grid=(Mp // bm, Np // bn),
            in_specs=[
                pl.BlockSpec((bm, Kp), lambda i, j: (i, 0)),
                pl.BlockSpec((Kp, bn), lambda i, j: (0, j)),
                pl.BlockSpec((1, bn), lambda i, j: (0, j)),
            ],
            out_specs=pl.BlockSpec((bm, bn), lambda i, j: (i, j)),
            compiler_params=pltpu.CompilerParams(
                dimension_semantics=("parallel", "parallel")),
        )(ap, bp, biasp)
    else:
        out = pl.pallas_call(
            functools.partial(_mm_kernel_acc, act=act),
            out_shape=jax.ShapeDtypeStruct((Mp, Np), jnp.float32),
            grid_spec=pltpu.PrefetchScalarGridSpec(
                num_scalar_prefetch=0,
                grid=(Mp // bm, Np // bn, Kp // bk),
                in_specs=[
                    pl.BlockSpec((bm, bk), lambda i, j, k: (i, k)),
                    pl.BlockSpec((bk, bn), lambda i, j, k: (k, j)),
                    pl.BlockSpec((1, bn), lambda i, j, k: (0, j)),
                ],
                out_specs=pl.BlockSpec((bm, bn), lambda i, j, k: (i, j)),
                scratch_shapes=[pltpu.VMEM((bm, bn), jnp.float32)]),
            compiler_params=pltpu.CompilerParams(
                dimension_semantics=("parallel", "parallel", "arbitrary")),
        )(ap, bp, biasp)

    if (Mp, Np) != (M, N):
        out = out[:M, :N]
    return out


# ------------------------------------------------------------------ attention kernel

def _attn_kernel(q_ref, k_ref, v_ref, o_ref, *, scale):
    q = q_ref[0, 0]                       # (Nq, D)  -- D is the REAL head dim, unpadded
    k = k_ref[0, 0]                       # (Nk, D)
    v = v_ref[0, 0]                       # (Nk, D)
    s = jax.lax.dot_general(q, k, (((1,), (1,)), ((), ())),
                            preferred_element_type=jnp.float32) * scale
    m = jnp.max(s, axis=-1, keepdims=True)
    p = jnp.exp(s - m)
    l = jnp.sum(p, axis=-1, keepdims=True)
    o = jnp.dot(p, v, preferred_element_type=jnp.float32)
    o_ref[0, 0] = (o * pl.reciprocal(l, approx=True)).astype(o_ref.dtype)


@functools.partial(jax.jit, static_argnames=("scale",))
def pallas_attention(q, k, v, *, scale):
    """q: (B, H, Nq, D), k/v: (B, H, Nk, D) -> (B, H, Nq, D) f32 (no head-dim padding)."""
    B, H, Nq, D = q.shape
    Nk = k.shape[2]
    return pl.pallas_call(
        functools.partial(_attn_kernel, scale=scale),
        out_shape=jax.ShapeDtypeStruct((B, H, Nq, D), jnp.float32),
        grid=(B, H),
        in_specs=[
            pl.BlockSpec((1, 1, Nq, D), lambda i, j: (i, j, 0, 0)),
            pl.BlockSpec((1, 1, Nk, D), lambda i, j: (i, j, 0, 0)),
            pl.BlockSpec((1, 1, Nk, D), lambda i, j: (i, j, 0, 0)),
        ],
        out_specs=pl.BlockSpec((1, 1, Nq, D), lambda i, j: (i, j, 0, 0)),
        compiler_params=pltpu.CompilerParams(
            dimension_semantics=("parallel", "parallel")),
    )(q, k, v)


# ------------------------------------------------------------------ norm kernels

def _gn_kernel(x_ref, gm_ref, gmt_ref, gamma_ref, beta_ref, o_ref, *,
               eps, inv_count, act):
    x = x_ref[0]                                        # (HW, C)
    ch_sum = jnp.sum(x, axis=0, keepdims=True)          # (1, C)
    ch_sq = jnp.sum(x * x, axis=0, keepdims=True)       # (1, C)
    g_sum = jnp.dot(ch_sum, gm_ref[...], preferred_element_type=jnp.float32)   # (1, G)
    g_sq = jnp.dot(ch_sq, gm_ref[...], preferred_element_type=jnp.float32)
    mean_g = g_sum * inv_count
    var_g = jnp.maximum(g_sq * inv_count - mean_g * mean_g, 0.0)
    rstd_g = jax.lax.rsqrt(var_g + eps)
    mean_c = jnp.dot(mean_g, gmt_ref[...], preferred_element_type=jnp.float32)  # (1, C)
    rstd_c = jnp.dot(rstd_g, gmt_ref[...], preferred_element_type=jnp.float32)
    y = (x - mean_c) * (rstd_c * gamma_ref[...]) + beta_ref[...]
    if act == "silu":
        y = y * jax.nn.sigmoid(y)
    o_ref[0] = y.astype(o_ref.dtype)


@functools.lru_cache(maxsize=None)
def _group_one_hot(C, groups):
    cg = C // groups
    gm = (np.arange(C)[:, None] // cg == np.arange(groups)[None, :]).astype(np.float32)
    gmt = np.ascontiguousarray(gm.T)
    return gm, gmt


@functools.partial(jax.jit, static_argnames=("groups", "eps", "act"))
def group_norm(x, p, *, groups, eps, act=None):
    """GroupNorm + affine (+ optional SiLU) fused in a single read/write pass."""
    N, H, W, C = x.shape
    cg = C // groups
    gm, gmt = _group_one_hot(C, groups)
    xr = x.reshape(N, H * W, C).astype(jnp.float32)
    out = pl.pallas_call(
        functools.partial(_gn_kernel, eps=eps, inv_count=1.0 / (H * W * cg), act=act),
        out_shape=jax.ShapeDtypeStruct((N, H * W, C), jnp.float32),
        grid=(N,),
        in_specs=[
            pl.BlockSpec((1, H * W, C), lambda i: (i, 0, 0)),
            pl.BlockSpec((C, groups), lambda i: (0, 0)),
            pl.BlockSpec((groups, C), lambda i: (0, 0)),
            pl.BlockSpec((1, C), lambda i: (0, 0)),
            pl.BlockSpec((1, C), lambda i: (0, 0)),
        ],
        out_specs=pl.BlockSpec((1, H * W, C), lambda i: (i, 0, 0)),
        compiler_params=pltpu.CompilerParams(dimension_semantics=("parallel",)),
    )(xr, gm, gmt, p["g"].reshape(1, C), p["b"].reshape(1, C))
    return out.reshape(N, H, W, C)


def _ln_kernel(x_ref, g_ref, b_ref, o_ref, *, eps):
    x = x_ref[...]
    mean = jnp.mean(x, axis=-1, keepdims=True)
    d = x - mean
    var = jnp.mean(d * d, axis=-1, keepdims=True)
    y = d * jax.lax.rsqrt(var + eps) * g_ref[...] + b_ref[...]
    o_ref[...] = y.astype(o_ref.dtype)


@functools.partial(jax.jit, static_argnames=("eps",))
def layer_norm(x, p, *, eps=1e-5):
    """LayerNorm + affine fused, 256-row blocks."""
    shp = x.shape
    C = shp[-1]
    x2 = x.reshape(-1, C).astype(jnp.float32)
    R = x2.shape[0]
    br = 256 if R >= 256 else _round_up(R, 8)
    Rp = _round_up(R, br)
    if Rp != R:
        x2 = jnp.pad(x2, ((0, Rp - R), (0, 0)))
    out = pl.pallas_call(
        functools.partial(_ln_kernel, eps=eps),
        out_shape=jax.ShapeDtypeStruct((Rp, C), jnp.float32),
        grid=(Rp // br,),
        in_specs=[
            pl.BlockSpec((br, C), lambda i: (i, 0)),
            pl.BlockSpec((1, C), lambda i: (0, 0)),
            pl.BlockSpec((1, C), lambda i: (0, 0)),
        ],
        out_specs=pl.BlockSpec((br, C), lambda i: (i, 0)),
        compiler_params=pltpu.CompilerParams(dimension_semantics=("parallel",)),
    )(x2, p["g"].reshape(1, C), p["b"].reshape(1, C))
    if Rp != R:
        out = out[:R]
    return out.reshape(shp)


# ------------------------------------------------------------------ layers (glue + kernels)

def silu(x):
    return x * jax.nn.sigmoid(x)


def linear(x, p, act=None):
    shp = x.shape
    y = pallas_matmul(x.reshape(-1, shp[-1]), p["w"], p["b"], act=act)
    return y.reshape(shp[:-1] + (p["w"].shape[1],))


@functools.partial(jax.jit, static_argnames=("stride", "pad", "act"))
def conv2d(x, p, *, stride=1, pad=1, act=None):
    """x: (N, H, W, Cin) -> (N, Ho, Wo, Cout). im2col + Pallas matmul."""
    # TODO(synk): fold the kh*kw taps into the matmul grid (reduction axis) to avoid the
    #             im2col materialization; kept in JAX here for robustness at these sizes.
    w = p["w"]
    kh, kw, cin, cout = w.shape
    N, H, W, C = x.shape
    if kh == 1 and kw == 1 and stride == 1 and pad == 0:
        cols = x.reshape(N * H * W, C)
        Ho, Wo = H, W
    else:
        xp = jnp.pad(x, ((0, 0), (pad, pad), (pad, pad), (0, 0)))
        Ho = (H + 2 * pad - kh) // stride + 1
        Wo = (W + 2 * pad - kw) // stride + 1
        patches = []
        for iy in range(kh):
            for ix in range(kw):
                patches.append(
                    xp[:, iy:iy + stride * (Ho - 1) + 1:stride,
                          ix:ix + stride * (Wo - 1) + 1:stride, :])
        cols = jnp.concatenate(patches, axis=-1).reshape(N * Ho * Wo, kh * kw * C)
    wm = w.reshape(kh * kw * cin, cout)
    y = pallas_matmul(cols, wm, p["b"], act=act)
    return y.reshape(N, Ho, Wo, cout)


def attention_module(x, ctx, p):
    """CrossAttention / SelfAttention: q from x, k/v from ctx (fused projections)."""
    b, n, _ = x.shape
    nk = ctx.shape[1]
    h, dh = p["heads"], p["dim_head"]
    inner = h * dh
    if ctx is x and "w_qkv" in p:
        qkv = pallas_matmul(x.reshape(b * n, x.shape[-1]), p["w_qkv"])
        q, k, v = jnp.split(qkv.reshape(b, n, 3 * inner), 3, axis=-1)
    else:
        q = pallas_matmul(x.reshape(b * n, x.shape[-1]), p["to_q"]["w"]).reshape(b, n, inner)
        kv = pallas_matmul(ctx.reshape(b * nk, ctx.shape[-1]), p["w_kv"])
        k, v = jnp.split(kv.reshape(b, nk, 2 * inner), 2, axis=-1)
    q = q.reshape(b, n, h, dh).transpose(0, 2, 1, 3)     # (b, h, n, dh)
    k = k.reshape(b, nk, h, dh).transpose(0, 2, 1, 3)
    v = v.reshape(b, nk, h, dh).transpose(0, 2, 1, 3)
    o = pallas_attention(q, k, v, scale=dh ** -0.5)
    o = o.transpose(0, 2, 1, 3).reshape(b, n, inner)
    return linear(o, p["to_out"])                        # dropout p=0 -> identity


def resnet_block(x, temb, p, groups, eps):
    # TODO(synk): the time-emb broadcast add and the final residual add could be fused
    #             into the conv matmul epilogue; kept as plain adds for simplicity.
    h = group_norm(x, p["norm1"], groups=groups, eps=eps, act="silu")
    h = conv2d(h, p["conv1"], stride=1, pad=1)
    t = linear(silu(temb), p["time_emb_proj"])
    h = h + t[:, None, None, :]
    h = group_norm(h, p["norm2"], groups=groups, eps=eps, act="silu")
    h = conv2d(h, p["conv2"], stride=1, pad=1)
    if "shortcut" in p:
        x = conv2d(x, p["shortcut"], stride=1, pad=0)
    return x + h


def transformer2d(x, ctx, p, groups):
    N, H, W, C = x.shape
    residual = x
    h = group_norm(x, p["norm"], groups=groups, eps=1e-6, act=None)
    h = conv2d(h, p["proj_in"], stride=1, pad=0)
    hseq = h.reshape(N, H * W, C)
    # self-attention
    hn = layer_norm(hseq, p["norm1"])
    hseq = hseq + attention_module(hn, hn, p["attn1"])
    # cross-attention
    hn = layer_norm(hseq, p["norm2"])
    hseq = hseq + attention_module(hn, ctx, p["attn2"])
    # GEGLU feed-forward
    hn = layer_norm(hseq, p["norm3"])
    ff = linear(hn, p["ff_proj"])
    a, g = jnp.split(ff, 2, axis=-1)
    hseq = hseq + linear(a * jax.nn.gelu(g, approximate=False), p["ff_out"])
    h = hseq.reshape(N, H, W, C)
    h = conv2d(h, p["proj_out"], stride=1, pad=0)
    return h + residual


def upsample_nearest_2x(x):
    x = jnp.repeat(x, 2, axis=1)
    return jnp.repeat(x, 2, axis=2)


def timestep_sinusoidal(t, dim):
    """diffusers Timesteps: flip_sin_to_cos=True, freq_shift=0."""
    half = dim // 2
    exponent = -math.log(10000.0) * jnp.arange(half, dtype=jnp.float32) / half
    freqs = jnp.exp(exponent)
    args = t.astype(jnp.float32)[:, None] * freqs[None]
    emb = jnp.concatenate([jnp.sin(args), jnp.cos(args)], axis=-1)
    return jnp.concatenate([emb[:, half:], emb[:, :half]], axis=-1)


def timestep_embedding_mlp(x, p):
    h = linear(x, p["linear_1"], act="silu")
    return linear(h, p["linear_2"])


# ------------------------------------------------------------------ parameter init

class ParamGen:
    def __init__(self, key):
        self.key = key
        self.count = 0

    def next(self, shape, scale=0.02):
        self.count += 1
        k = jax.random.fold_in(self.key, self.count)
        return (scale * jax.random.normal(k, shape)).astype(jnp.float32)


def init_linear(pg, din, dout, bias=True):
    return {"w": pg.next((din, dout)),
            "b": pg.next((dout,)) if bias else None}


def init_conv(pg, cin, cout, k):
    return {"w": pg.next((k, k, cin, cout)), "b": pg.next((cout,))}


def init_gn(c):
    return {"g": jnp.ones((c,), jnp.float32), "b": jnp.zeros((c,), jnp.float32)}


def init_ln(c):
    return {"g": jnp.ones((c,), jnp.float32), "b": jnp.zeros((c,), jnp.float32)}


def init_attn(pg, dim, ctx_dim, heads, dim_head):
    inner = heads * dim_head
    p = {"to_q": init_linear(pg, dim, inner, bias=False),
         "to_k": init_linear(pg, ctx_dim, inner, bias=False),
         "to_v": init_linear(pg, ctx_dim, inner, bias=False),
         "to_out": init_linear(pg, inner, dim),   # TODO(synk): PyTorch zero-inits to_out
         "heads": heads, "dim_head": dim_head}
    # pre-fused projection weights (fewer, wider, lane-dense matmuls at runtime)
    p["w_kv"] = jnp.concatenate([p["to_k"]["w"], p["to_v"]["w"]], axis=1)
    if dim == ctx_dim:
        p["w_qkv"] = jnp.concatenate([p["to_q"]["w"], p["w_kv"]], axis=1)
    return p


def init_resnet(pg, cin, cout, temb_dim, groups):
    p = {"norm1": init_gn(cin), "conv1": init_conv(pg, cin, cout, 3),
         "time_emb_proj": init_linear(pg, temb_dim, cout),
         "norm2": init_gn(cout), "conv2": init_conv(pg, cout, cout, 3)}
    if cin != cout:
        p["shortcut"] = init_conv(pg, cin, cout, 1)
    return p


def init_transformer(pg, ch, heads, ctx_dim):
    d_head = ch // heads
    return {"norm": init_gn(ch),
            "proj_in": init_conv(pg, ch, ch, 1),
            "norm1": init_ln(ch), "attn1": init_attn(pg, ch, ch, heads, d_head),
            "norm2": init_ln(ch), "attn2": init_attn(pg, ch, ctx_dim, heads, d_head),
            "norm3": init_ln(ch),
            "ff_proj": init_linear(pg, ch, ch * 8),
            "ff_out": init_linear(pg, ch * 4, ch),
            "proj_out": init_conv(pg, ch, ch, 1)}


def init_model(key):
    pg = ParamGen(key)
    boc = [32, 64, 128, 128]        # scaled-down block_out_channels
    heads = 8                       # attention_head_dim (SD quirk: # of heads)
    ctx_dim = 32                    # scaled cross_attention_dim
    groups = 8                      # scaled norm_num_groups
    layers_per_block = 1
    temb_dim = boc[0] * 4

    P = {"boc": boc, "heads": heads, "groups": groups, "eps": 1e-5,
         "time_proj_dim": boc[0]}

    P["time_embedding"] = {"linear_1": init_linear(pg, boc[0], temb_dim),
                           "linear_2": init_linear(pg, temb_dim, temb_dim)}
    P["Vs"] = pg.next((9, boc[0]))
    P["index_embedding"] = {"linear_1": init_linear(pg, boc[0], temb_dim),
                            "linear_2": init_linear(pg, temb_dim, temb_dim)}
    P["s"] = jnp.float32(0.5)       # TODO(synk): PyTorch zero-inits s
    P["conv_in"] = init_conv(pg, 9, boc[0], 3)

    down_types = ["cross", "cross", "cross", "down"]
    P["down_blocks"], P["global_down"] = [], []
    in_ch = boc[0]
    for i, t in enumerate(down_types):
        out_ch = boc[i]
        dim = in_ch                                  # resnets[0].in_channels
        P["global_down"].append(init_attn(pg, dim, dim, heads, dim // heads))
        blk = {"has_cross_attention": t == "cross", "resnets": [], "attentions": []}
        ch = in_ch
        for _ in range(layers_per_block):
            blk["resnets"].append(init_resnet(pg, ch, out_ch, temb_dim, groups))
            ch = out_ch
            if t == "cross":
                blk["attentions"].append(init_transformer(pg, out_ch, heads, ctx_dim))
        blk["downsampler"] = init_conv(pg, out_ch, out_ch, 3) if i < 3 else None
        P["down_blocks"].append(blk)
        in_ch = out_ch

    mid_ch = boc[-1]
    P["mid"] = {"resnets": [init_resnet(pg, mid_ch, mid_ch, temb_dim, groups),
                            init_resnet(pg, mid_ch, mid_ch, temb_dim, groups)],
                "attn": init_transformer(pg, mid_ch, heads, ctx_dim)}
    P["global_mid"] = init_attn(pg, mid_ch, mid_ch, heads, boc[2] // heads)

    rev = boc[::-1]
    up_types = ["up", "cross", "cross", "cross"]
    P["up_blocks"], P["global_up"] = [], []
    out_ch = rev[0]
    for i, t in enumerate(up_types):
        prev_out = out_ch
        out_ch = rev[i]
        in_ch_blk = rev[min(i + 1, 3)]
        P["global_up"].append(init_attn(pg, prev_out, prev_out, heads, prev_out // heads))
        n_layers = layers_per_block + 1
        blk = {"has_cross_attention": t == "cross", "resnets": [], "attentions": []}
        for j in range(n_layers):
            res_skip = in_ch_blk if j == n_layers - 1 else out_ch
            res_in = prev_out if j == 0 else out_ch
            blk["resnets"].append(init_resnet(pg, res_in + res_skip, out_ch, temb_dim, groups))
            if t == "cross":
                blk["attentions"].append(init_transformer(pg, out_ch, heads, ctx_dim))
        blk["upsampler"] = init_conv(pg, out_ch, out_ch, 3) if i < 3 else None
        P["up_blocks"].append(blk)

    P["conv_norm_out"] = init_gn(boc[0])
    P["conv_out"] = init_conv(pg, boc[0], 4, 3)
    return P


# ------------------------------------------------------------------ forward pass

def global_self_attention(hidden, p, b, m):
    """hidden: (b*m, h, w, c) -> joint attention over all views -> same shape."""
    bm, h, w, c = hidden.shape
    x = hidden.reshape(b, m * h * w, c)
    x = attention_module(x, x, p)
    return x.reshape(b * m, h, w, c)


def multiview_unet_forward(P, latents, timestep, prompt_embd, idxs):
    groups, eps = P["groups"], P["eps"]
    b, m, c, h, w = latents.shape
    _, _, l, cp = prompt_embd.shape

    hidden = latents.reshape(b * m, c, h, w).transpose(0, 2, 3, 1)  # -> NHWC
    ctx = prompt_embd.reshape(b * m, l, cp)
    ts = timestep.reshape(-1)

    t_emb = timestep_sinusoidal(ts, P["time_proj_dim"])
    t_emb = timestep_embedding_mlp(t_emb, P["time_embedding"])
    img_emb = P["Vs"][idxs.reshape(-1)]
    img_emb = timestep_embedding_mlp(img_emb, P["index_embedding"])
    emb = t_emb + P["s"] * img_emb

    hidden = conv2d(hidden, P["conv_in"], stride=1, pad=1)
    res_stack = [hidden]

    for i, blk in enumerate(P["down_blocks"]):
        if m > 1:
            hidden = global_self_attention(hidden, P["global_down"][i], b, m)
        if blk["has_cross_attention"]:
            for rp, ap in zip(blk["resnets"], blk["attentions"]):
                hidden = resnet_block(hidden, emb, rp, groups, eps)
                hidden = transformer2d(hidden, ctx, ap, groups)
                res_stack.append(hidden)
        else:
            for rp in blk["resnets"]:
                hidden = resnet_block(hidden, emb, rp, groups, eps)
                res_stack.append(hidden)
        if blk["downsampler"] is not None:
            hidden = conv2d(hidden, blk["downsampler"], stride=2, pad=1)
            res_stack.append(hidden)

    # mid block
    hidden = resnet_block(hidden, emb, P["mid"]["resnets"][0], groups, eps)
    if m > 1:
        hidden = global_self_attention(hidden, P["global_mid"], b, m)
    hidden = transformer2d(hidden, ctx, P["mid"]["attn"], groups)
    hidden = resnet_block(hidden, emb, P["mid"]["resnets"][1], groups, eps)

    for i, blk in enumerate(P["up_blocks"]):
        n_res = len(blk["resnets"])
        skips = list(res_stack[-n_res:])
        res_stack = res_stack[:-n_res]
        if m > 1:
            hidden = global_self_attention(hidden, P["global_up"][i], b, m)
        if blk["has_cross_attention"]:
            for rp, ap in zip(blk["resnets"], blk["attentions"]):
                skip = skips.pop()
                hidden = jnp.concatenate([hidden, skip], axis=-1)
                hidden = resnet_block(hidden, emb, rp, groups, eps)
                hidden = transformer2d(hidden, ctx, ap, groups)
        else:
            for rp in blk["resnets"]:
                skip = skips.pop()
                hidden = jnp.concatenate([hidden, skip], axis=-1)
                hidden = resnet_block(hidden, emb, rp, groups, eps)
        if blk["upsampler"] is not None:
            hidden = upsample_nearest_2x(hidden)
            hidden = conv2d(hidden, blk["upsampler"], stride=1, pad=1)

    sample = group_norm(hidden, P["conv_norm_out"], groups=groups, eps=eps, act="silu")
    sample = conv2d(sample, P["conv_out"], stride=1, pad=1)

    N, H, W, C = sample.shape
    return sample.transpose(0, 3, 1, 2).reshape(b, m, C, H, W)


# ------------------------------------------------------------------ main

if __name__ == "__main__":
    key = jax.random.PRNGKey(0)
    P = init_model(key)

    b, m, c, h, w = 2, 2, 9, 16, 16
    l, cp = 8, 32
    k1, k2 = jax.random.split(jax.random.PRNGKey(0))
    latents = jax.random.normal(k1, (b, m, c, h, w), jnp.float32)
    prompt_embd = jax.random.normal(k2, (b, m, l, cp), jnp.float32)
    timestep = jnp.full((b, m), 10, jnp.int32)
    idxs = (jnp.arange(b * m, dtype=jnp.int32) % 9).reshape(b, m)

    out = multiview_unet_forward(P, latents, timestep, prompt_embd, idxs)
    out = jax.block_until_ready(out)
    assert out.shape == (b, m, 4, h, w), out.shape
    assert bool(jnp.all(jnp.isfinite(out)))
    print("KERNEL_OK")
</pallas_src>

<mosaic_0001>
module attributes {stable_mosaic.version = 11 : i64} {
  func.func @_mm_kernel_single(%arg0: i32, %arg1: i32, %arg2: memref<8x128xbf16, #tpu.memory_space<vmem>>, %arg3: memref<128x128xbf16, #tpu.memory_space<vmem>>, %arg4: memref<1x128xf32, #tpu.memory_space<vmem>>, %arg5: memref<8x128xf32, #tpu.memory_space<vmem>>) attributes {dimension_semantics = [#tpu.dimension_semantics<parallel>, #tpu.dimension_semantics<parallel>], iteration_bounds = array<i64: 1, 1>, scalar_prefetch = 0 : i64, scratch_operands = 0 : i64, tpu.core_type = #tpu.core_type<tc>, window_params = [{transform_indices = @transform_0, window_bounds = array<i64: 8, 128>}, {transform_indices = @transform_1, window_bounds = array<i64: 128, 128>}, {transform_indices = @transform_2, window_bounds = array<i64: 1, 128>}, {transform_indices = @transform_3, window_bounds = array<i64: 8, 128>}]} {
    %c0 = arith.constant 0 : index
    %c0_0 = arith.constant 0 : index
    %0 = vector.load %arg2[%c0, %c0_0] : memref<8x128xbf16, #tpu.memory_space<vmem>>, vector<8x128xbf16>
    %c0_1 = arith.constant 0 : index
    %c0_2 = arith.constant 0 : index
    %1 = vector.load %arg3[%c0_1, %c0_2] : memref<128x128xbf16, #tpu.memory_space<vmem>>, vector<128x128xbf16>
    %cst = arith.constant dense<0.000000e+00> : vector<8x128xf32>
    %2 = tpu.matmul %0, %1, %cst {dimension_numbers = #tpu.dot_dimension_numbers<[1], [0], [0], [1], [0, 0, 1, 1], [], []>} : vector<8x128xbf16>, vector<128x128xbf16>, vector<8x128xf32> -> vector<8x128xf32>
    %c0_3 = arith.constant 0 : index
    %c0_4 = arith.constant 0 : index
    %3 = vector.load %arg4[%c0_3, %c0_4] : memref<1x128xf32, #tpu.memory_space<vmem>>, vector<1x128xf32>
    %4 = vector.broadcast %3 : vector<1x128xf32> to vector<8x128xf32>
    %5 = arith.addf %2, %4 : vector<8x128xf32>
    %6 = arith.negf %5 : vector<8x128xf32>
    %7 = math.exp %6 : vector<8x128xf32>
    %cst_5 = arith.constant 1.000000e+00 : f32
    %8 = vector.broadcast %cst_5 : f32 to vector<8x128xf32>
    %9 = arith.addf %8, %7 : vector<8x128xf32>
    %10 = arith.divf %8, %9 : vector<8x128xf32>
    %11 = arith.mulf %5, %10 : vector<8x128xf32>
    %c0_6 = arith.constant 0 : index
    %c0_7 = arith.constant 0 : index
    %12 = vector.load %arg5[%c0_6, %c0_7] : memref<8x128xf32, #tpu.memory_space<vmem>>, vector<8x128xf32>
    tpu.vector_store %arg5[%c0_6, %c0_7], %11 {strides = array<i32>} : memref<8x128xf32, #tpu.memory_space<vmem>>, vector<8x128xf32>,
    return
  }
  func.func @transform_0(%arg0: i32, %arg1: i32) -> (i32, i32) {
    %c0_i32 = arith.constant 0 : i32
    %c0_i32_0 = arith.constant 0 : i32
    return %arg0, %c0_i32 : i32, i32
  }
  func.func @transform_1(%arg0: i32, %arg1: i32) -> (i32, i32) {
    %c0_i32 = arith.constant 0 : i32
    %c0_i32_0 = arith.constant 0 : i32
    return %c0_i32, %arg1 : i32, i32
  }
  func.func @transform_2(%arg0: i32, %arg1: i32) -> (i32, i32) {
    %c0_i32 = arith.constant 0 : i32
    %c0_i32_0 = arith.constant 0 : i32
    return %c0_i32, %arg1 : i32, i32
  }
  func.func @transform_3(%arg0: i32, %arg1: i32) -> (i32, i32) {
    %c0_i32 = arith.constant 0 : i32
    return %arg0, %arg1 : i32, i32
  }
}

</mosaic_0001>

<bundles_post_ra>
// kernel: pallas_matmul.1
= control target key start
LH: loop header
LB: loop body
LE: loop exit
PB: predicated region body
PF: predicated region fallthrough
CT: control target
= control target key end

     0   :  { %s220_s1 = inlined_call_operand.vmem [shape: bf16[128,128], index: 1, kind: input, shape index: {}]   ;;  %s221_s2 = inlined_call_operand.vmem [shape: f32[1,128], index: 2, kind: input, shape index: {}]   ;;  %s222_s0 = inlined_call_operand.vmem [shape: bf16[8,128], index: 0, kind: input, shape index: {}]   ;;  %s223_s3 = inlined_call_operand.vmem [shape: f32[8,128], index: 3, kind: output, shape index: {}]  }
   0x1   :  { %v161_v0 = vld [vmem:[%s220_s1 + $0x38] sm:$0xff]  ;;  %v160_v1 = vld [vmem:[%s220_s1 + $0x30] sm:$0xff]  ;;  %v159_v2 = vld [vmem:[%s220_s1 + $0x28] sm:$0xff] }
   0x2   :  { %83 = vmatpush.bf16.msra.mxu0 %v161_v0  ;;  %v158_v3 = vld [vmem:[%s220_s1 + $0x20] sm:$0xff]  ;;  %v157_v4 = vld [vmem:[%s220_s1 + $0x18] sm:$0xff]  ;;  %v156_v5 = vld [vmem:[%s220_s1 + $0x10] sm:$0xff] }
   0x3   :  { %v155_v6 = vld [vmem:[%s220_s1 + $0x8] sm:$0xff]  ;;  %v154_v7 = vld [vmem:[%s220_s1] sm:$0xff] }
   0x4   :  { %v14_v8 = vld [vmem:[%s222_s0] sm:$0xf] }
   0x5   :  { %v162_v9 = vld [vmem:[%s221_s2] ss:$0 sm:$0xff] }
   0x6   :  { %84 = vmatpush.bf16.msra.mxu0 %v160_v1 }
   0xa   :  { %85 = vmatpush.bf16.msra.mxu0 %v159_v2 }
   0xe   :  { %86 = vmatpush.bf16.msra.mxu0 %v158_v3 }
  0x12   :  { %87 = vmatpush.bf16.msra.mxu0 %v157_v4 }
  0x16   :  { %88 = vmatpush.bf16.msra.mxu0 %v156_v5 }
  0x1a   :  { %89 = vmatpush.bf16.msra.mxu0 %v155_v6 }
  0x1e   :  { %90 = vmatpush.bf16.msra.mxu0 %v154_v7 }
  0x21   :  { %91 = vmatmul.bf16.vlgmr.msra.gmra.mxu0 %v14_v8 }
  0x9e   :  { %v92_v10 = vpop.f32.mrf.mxu0 }
  0x9f   :  { %v93_v11 = vadd.f32 %v162_v9, %v92_v10 }
  0xa1   :  { %v153_v12 = vmul.f32 -1.442695, %v93_v11 }
  0xa3   :  { %163 = vpow2.f32 %v153_v12 }
  0xa6   :  { %v94_v13 = vpop.f32.mrf.mxu0 }
  0xa9   :  { %v164_v14 = vpop.eup %163 }
  0xaa   :  { %v99_v15 = vadd.f32 1.0, %v164_v14 }
  0xac   :  { %165 = vrcp.f32 %v99_v15  ;;  %v111_v19 = vand.u32 2147483648, %v99_v15  ;;  %v109_v21 = vand.u32 2147483647, %v99_v15  ;;  %vm105_vm1 = vweird.f32 %v99_v15 }
  0xae   :  { %v112_v23 = vor.u32 1.1754944e-38, %v111_v19  ;;  %vm110_vm3 = vcmp.eq.f32.partialorder %v109_v21, 8.507059e+37 }
  0xb2   :  { %v166_v16 = vpop.eup %165 }
  0xb3   :  { %v101_v17 = vmul.f32 %v166_v16, %v99_v15  ;;  %vm106_vm0 = vweird.f32 %v166_v16 }
  0xb4   :  { %vm107_vm2 = vmor %vm105_vm1, %vm106_vm0 }
  0xb5   :  { %v102_v18 = vsub.f32 1.0, %v101_v17 }
  0xb7   :  { %v103_v20 = vmul.f32 %v166_v16, %v102_v18 }
  0xb9   :  { %v104_v22 = vadd.f32 %v166_v16, %v103_v20 }
  0xbb   :  { %v108_v24 = vsel %vm107_vm2, %v166_v16, %v104_v22 }
  0xbc   :  { %v113_v25 = vsel %vm110_vm3, %v112_v23, %v108_v24 }
  0xbd   :  { %v115_v26 = vmul.f32 %v113_v25, %v93_v11 }
  0xbf   :  { %116 = vst [vmem:[%s223_s3] sm:$0xff] %v115_v26 }

</bundles_post_ra>
